<compile_context>
chip_gen: v7x
topology: tpu7x:2x2x1
jax: 0.10.0
libtpu: 0.0.40
codegen_flags: <defaults>
</compile_context>

<pallas_src>
import functools

import jax
import jax.numpy as jnp
from jax import lax
from jax.experimental import pallas as pl
from jax.experimental.pallas import tpu as pltpu


# ----------------------------- helpers -------------------------------------

def _round_up(n, m):
    return (n + m - 1) // m * m


def _sublane(dtype):
    itemsize = jnp.dtype(dtype).itemsize
    return 8 * max(1, 4 // itemsize)          # f32 -> 8, bf16 -> 16, int8 -> 32


def _vmem_tile_bytes(rows, cols, dtype):
    """VMEM footprint of a (rows, cols) tile incl. sublane/lane padding."""
    itemsize = jnp.dtype(dtype).itemsize
    return _round_up(rows, _sublane(dtype)) * _round_up(cols, 128) * itemsize


def _vmem_budget():
    """(usable vmem_limit cap, per-block byte target) derived from the chip."""
    try:
        cap = int(pltpu.get_tpu_info().vmem_capacity_bytes)
    except Exception:  # e.g. interpret mode / non-TPU tracing
        cap = 128 << 20
    usable = max(min(cap - (12 << 20), 100 << 20), 16 << 20)   # leave headroom
    target = (8 << 20) if cap >= (96 << 20) else (4 << 20)     # v5e/v6e vs v7x
    return usable, target


def _pick_block_b(B, row_vmem_bytes, target_block_bytes, min_steps=4):
    """Byte-targeted batch block (no divisor-of-B requirement; cdiv pads the
    tail).  Keeps >= min_steps grid steps when B allows so each of v7x's two
    TensorCores gets >= 2 pipelined steps of the 'parallel' axis."""
    if B <= 1:
        return 1
    by_bytes = max(1, int(target_block_bytes // max(row_vmem_bytes, 1)))
    by_steps = max(1, B // min_steps)
    return max(1, min(by_bytes, by_steps, B))


# ----------------------------- kernels --------------------------------------

def _se_fused_kernel(x_ref, w1_ref, w2_ref, o_ref):
    # x_ref: (Bb, C, HW)  w1_ref: (C, mid)  w2_ref: (mid, C)  o_ref: (Bb, C, HW)
    x = x_ref[...]                                   # stays in input dtype
    inv_hw = jnp.float32(1.0 / x_ref.shape[-1])      # compile-time reciprocal

    # Squeeze: lane-axis reduction with f32 accumulation.
    pooled = jnp.sum(x, axis=-1, dtype=jnp.float32) * inv_hw            # (Bb, C)

    # Excitation: fc1 -> relu -> fc2 -> sigmoid, all f32 (tiny, hidden by DMA).
    h = jnp.maximum(
        jnp.dot(pooled, w1_ref[...], preferred_element_type=jnp.float32), 0.0)
    y = jax.nn.sigmoid(
        jnp.dot(h, w2_ref[...], preferred_element_type=jnp.float32))    # (Bb, C)

    # Scale + residual: x*y + x == x*(1+y).  The multiply is done in the input
    # dtype (native bf16 VPU on v6e/v7x; on v5e it converts either way and the
    # kernel is HBM-bound, so this is neutral there).
    # TODO(synk): confirm via pl.lower_as_mlir that this (Bb,C)->(Bb,C,1)
    # broadcast does not materialize a full-size slab / extra VMEM round-trip.
    scale = (1.0 + y).astype(x.dtype)[:, :, None]                       # (Bb,C,1)
    o_ref[...] = (x * scale).astype(o_ref.dtype)


def _se_pool_excite_kernel(x_ref, w1_ref, w2_ref, y_ref, acc_ref, *, hw_total):
    # Two-phase pass A: accumulate the spatial sum over HW chunks, then run
    # the excitation MLP once at the last chunk.
    hw_i = pl.program_id(1)

    @pl.when(hw_i == 0)
    def _():
        acc_ref[...] = jnp.zeros_like(acc_ref)

    x = x_ref[...].astype(jnp.float32)               # (Bb, C, hw_chunk)
    hw_chunk = x_ref.shape[-1]
    pos = hw_i * hw_chunk + lax.broadcasted_iota(jnp.int32, x.shape, dimension=2)
    x = jnp.where(pos < hw_total, x, 0.0)            # mask padded tail chunk
    acc_ref[...] += jnp.sum(x, axis=-1)              # (Bb, C)

    @pl.when(hw_i == pl.num_programs(1) - 1)
    def _():
        pooled = acc_ref[...] * jnp.float32(1.0 / hw_total)
        h = jnp.maximum(
            jnp.dot(pooled, w1_ref[...], preferred_element_type=jnp.float32), 0.0)
        y = jax.nn.sigmoid(
            jnp.dot(h, w2_ref[...], preferred_element_type=jnp.float32))
        y_ref[...] = y[:, :, None]                   # (Bb, C, 1)


def _se_scale_residual_kernel(x_ref, y_ref, o_ref):
    # Two-phase pass B: out = x * (1 + y)
    x = x_ref[...]                                   # (Bb, C, hw_chunk)
    scale = (1.0 + y_ref[...]).astype(x.dtype)       # (Bb, C, 1)
    o_ref[...] = (x * scale).astype(o_ref.dtype)


# ----------------------------- wrapper --------------------------------------

def se_block(x, w1, w2, *, block_b=None, hw_chunk=None, force_two_phase=False):
    """x: (B, C, H, W); w1: (C, mid) = fc1.weight.T; w2: (mid, C) = fc2.weight.T."""
    B, C, H, W = x.shape
    HW = H * W
    mid = w1.shape[1]
    itemsize = jnp.dtype(x.dtype).itemsize

    x2 = x.reshape(B, C, HW)                         # free reshape, HW on lanes
    # TODO(synk): for late SE stages (7x7/14x14) a (B, H*W, C) layout with C on
    # lanes avoids masked-lane waste, but only pays off if the surrounding
    # model is already NHWC (an extra HBM transpose here would cost more).

    vmem_cap, target_block_bytes = _vmem_budget()
    w_vmem = _vmem_tile_bytes(C, mid, w1.dtype) + _vmem_tile_bytes(mid, C, w2.dtype)
    row_vmem = _vmem_tile_bytes(C, HW, x.dtype)      # padded footprint of 1 row

    w_bytes = (C * mid + mid * C) * jnp.dtype(w1.dtype).itemsize
    bytes_x = B * C * HW * itemsize
    flops = 4 * B * C * mid + 3 * B * C * HW
    transcendentals = B * C

    # Fused path needs 2x(in)+2x(out) row blocks + 2x weights, even at block_b=1.
    fused_need_min = 4 * row_vmem + 2 * w_vmem + (4 << 20)
    use_fused = (not force_two_phase) and (fused_need_min <= vmem_cap)

    if use_fused:
        if block_b is None:
            block_b = _pick_block_b(B, row_vmem, target_block_bytes)
        grid_b = pl.cdiv(B, block_b)
        need = 4 * block_b * row_vmem + 2 * w_vmem
        vmem_limit = int(min(max(need + (4 << 20), 32 << 20), vmem_cap))

        out2 = pl.pallas_call(
            _se_fused_kernel,
            out_shape=jax.ShapeDtypeStruct((B, C, HW), x.dtype),
            grid=(grid_b,),
            in_specs=[
                pl.BlockSpec((block_b, C, HW), lambda b: (b, 0, 0)),
                pl.BlockSpec((C, mid), lambda b: (0, 0)),
                pl.BlockSpec((mid, C), lambda b: (0, 0)),
            ],
            out_specs=pl.BlockSpec((block_b, C, HW), lambda b: (b, 0, 0)),
            compiler_params=pltpu.CompilerParams(
                dimension_semantics=("parallel",),
                vmem_limit_bytes=vmem_limit,
            ),
            cost_estimate=pl.CostEstimate(
                flops=flops,
                transcendentals=transcendentals,
                bytes_accessed=2 * bytes_x + w_bytes,
            ),
        )(x2, w1, w2)
        return out2.reshape(B, C, H, W)

    # -------------------- two-phase fallback (huge rows) --------------------
    if block_b is None:
        block_b = 1
    if hw_chunk is None:
        per_row = _round_up(C, _sublane(x.dtype)) * itemsize * block_b
        hw_chunk = max(128, (target_block_bytes // max(per_row, 1)) // 128 * 128)
    if hw_chunk >= HW:
        hw_chunk = HW                               # single full-extent chunk
    grid_b = pl.cdiv(B, block_b)
    grid_hw = pl.cdiv(HW, hw_chunk)

    tile_vmem = block_b * _vmem_tile_bytes(C, hw_chunk, x.dtype)
    y_vmem = _vmem_tile_bytes(C, 1, jnp.float32) * block_b

    # Pass A: pooled sum over HW chunks, then the tiny excitation MLP.
    vmem_a = int(min(max(2 * tile_vmem + 2 * w_vmem + 3 * y_vmem + (4 << 20),
                         32 << 20), vmem_cap))
    y = pl.pallas_call(
        functools.partial(_se_pool_excite_kernel, hw_total=HW),
        out_shape=jax.ShapeDtypeStruct((B, C, 1), jnp.float32),
        grid=(grid_b, grid_hw),
        in_specs=[
            pl.BlockSpec((block_b, C, hw_chunk), lambda b, s: (b, 0, s)),
            pl.BlockSpec((C, mid), lambda b, s: (0, 0)),
            pl.BlockSpec((mid, C), lambda b, s: (0, 0)),
        ],
        out_specs=pl.BlockSpec((block_b, C, 1), lambda b, s: (b, 0, 0)),
        scratch_shapes=[pltpu.VMEM((block_b, C), jnp.float32)],
        compiler_params=pltpu.CompilerParams(
            dimension_semantics=("parallel", "arbitrary"),
            vmem_limit_bytes=vmem_a,
        ),
        cost_estimate=pl.CostEstimate(
            flops=4 * B * C * mid + B * C * HW,
            transcendentals=transcendentals,
            bytes_accessed=bytes_x + w_bytes + B * C * 4,
        ),
    )(x2, w1, w2)

    # Pass B: out = x * (1 + y), streamed in HW chunks.
    vmem_b = int(min(max(4 * tile_vmem + 2 * y_vmem + (4 << 20), 32 << 20), vmem_cap))
    out2 = pl.pallas_call(
        _se_scale_residual_kernel,
        out_shape=jax.ShapeDtypeStruct((B, C, HW), x.dtype),
        grid=(grid_b, grid_hw),
        in_specs=[
            pl.BlockSpec((block_b, C, hw_chunk), lambda b, s: (b, 0, s)),
            pl.BlockSpec((block_b, C, 1), lambda b, s: (b, 0, 0)),
        ],
        out_specs=pl.BlockSpec((block_b, C, hw_chunk), lambda b, s: (b, 0, s)),
        compiler_params=pltpu.CompilerParams(
            dimension_semantics=("parallel", "parallel"),
            vmem_limit_bytes=vmem_b,
        ),
        cost_estimate=pl.CostEstimate(
            flops=2 * B * C * HW,
            transcendentals=0,
            bytes_accessed=2 * bytes_x + B * C * 4,
        ),
    )(x2, y)
    return out2.reshape(B, C, H, W)


# ----------------------------- reference & test ------------------------------

def reference(x, w1, w2):
    pooled = jnp.mean(x, axis=(2, 3))                # (B, C)
    h = jnp.maximum(pooled @ w1, 0.0)
    y = jax.nn.sigmoid(h @ w2)                       # (B, C)
    return x * y[:, :, None, None] + x


if __name__ == "__main__":
    B, C, H, W = 2, 32, 16, 16
    reduction = 8
    mid = C // reduction

    key = jax.random.PRNGKey(0)
    kx, k1, k2 = jax.random.split(key, 3)

    x = jax.random.normal(kx, (B, C, H, W), dtype=jnp.float32)
    # Bias-free Linear weights, stored transposed vs PyTorch's (out, in) layout
    # so the kernel computes pooled @ W.
    w1 = jax.random.normal(k1, (C, mid), dtype=jnp.float32) * (1.0 / jnp.sqrt(C))
    w2 = jax.random.normal(k2, (mid, C), dtype=jnp.float32) * (1.0 / jnp.sqrt(mid))

    ref = reference(x, w1, w2)

    # 1) Fused single-pass path.
    out = jax.block_until_ready(se_block(x, w1, w2))
    assert out.shape == (B, C, H, W)
    assert jnp.allclose(out, ref, atol=1e-5, rtol=1e-5), "fused path mismatch"

    # 2) Padded tail batch block (block_b does not divide B).
    x3 = jax.random.normal(kx, (3, C, H, W), dtype=jnp.float32)
    ref3 = reference(x3, w1, w2)
    out3 = jax.block_until_ready(se_block(x3, w1, w2, block_b=2))
    assert jnp.allclose(out3, ref3, atol=1e-5, rtol=1e-5), "padded block mismatch"

    # 3) Two-phase (pool/excite + scale/residual) fallback used for rows that
    #    exceed the VMEM budget (forced here at small shapes to exercise it).
    out_tp = jax.block_until_ready(
        se_block(x, w1, w2, force_two_phase=True, hw_chunk=128))
    assert jnp.allclose(out_tp, ref, atol=1e-5, rtol=1e-5), "two-phase mismatch"

    print("KERNEL_OK")
</pallas_src>

<mosaic_0001>
module attributes {stable_mosaic.version = 11 : i64} {
  func.func @_se_fused_kernel(%arg0: i32, %arg1: memref<1x32x256xf32, #tpu.memory_space<vmem>>, %arg2: memref<32x4xf32, #tpu.memory_space<vmem>>, %arg3: memref<4x32xf32, #tpu.memory_space<vmem>>, %arg4: memref<1x32x256xf32, #tpu.memory_space<vmem>>) attributes {dimension_semantics = [#tpu.dimension_semantics<parallel>], iteration_bounds = array<i64: 2>, scalar_prefetch = 0 : i64, scratch_operands = 0 : i64, tpu.core_type = #tpu.core_type<tc>, window_params = [{transform_indices = @transform_0, window_bounds = array<i64: 1, 32, 256>}, {pipeline_mode = #tpu.pipeline_mode<synchronous>, transform_indices = @transform_1, window_bounds = array<i64: 32, 4>}, {pipeline_mode = #tpu.pipeline_mode<synchronous>, transform_indices = @transform_2, window_bounds = array<i64: 4, 32>}, {transform_indices = @transform_3, window_bounds = array<i64: 1, 32, 256>}]} {
    %c0 = arith.constant 0 : index
    %c0_0 = arith.constant 0 : index
    %c0_1 = arith.constant 0 : index
    %0 = vector.load %arg1[%c0, %c0_0, %c0_1] : memref<1x32x256xf32, #tpu.memory_space<vmem>>, vector<1x32x256xf32>
    %cst = arith.constant dense<0.000000e+00> : vector<1x32xf32>
    %1 = vector.multi_reduction <add>, %0, %cst [2] : vector<1x32x256xf32> to vector<1x32xf32>
    %cst_2 = arith.constant 3.906250e-03 : f32
    %2 = vector.broadcast %cst_2 : f32 to vector<1x32xf32>
    %3 = arith.mulf %1, %2 : vector<1x32xf32>
    %c0_3 = arith.constant 0 : index
    %c0_4 = arith.constant 0 : index
    %4 = vector.load %arg2[%c0_3, %c0_4] : memref<32x4xf32, #tpu.memory_space<vmem>>, vector<32x4xf32>
    %cst_5 = arith.constant dense<0.000000e+00> : vector<1x4xf32>
    %5 = tpu.matmul %3, %4, %cst_5 {dimension_numbers = #tpu.dot_dimension_numbers<[1], [0], [0], [1], [0, 0, 1, 1], [], []>} : vector<1x32xf32>, vector<32x4xf32>, vector<1x4xf32> -> vector<1x4xf32>
    %cst_6 = arith.constant 0.000000e+00 : f32
    %6 = vector.broadcast %cst_6 : f32 to vector<1x4xf32>
    %7 = arith.maximumf %5, %6 : vector<1x4xf32>
    %c0_7 = arith.constant 0 : index
    %c0_8 = arith.constant 0 : index
    %8 = vector.load %arg3[%c0_7, %c0_8] : memref<4x32xf32, #tpu.memory_space<vmem>>, vector<4x32xf32>
    %cst_9 = arith.constant dense<0.000000e+00> : vector<1x32xf32>
    %9 = tpu.matmul %7, %8, %cst_9 {dimension_numbers = #tpu.dot_dimension_numbers<[1], [0], [0], [1], [0, 0, 1, 1], [], []>} : vector<1x4xf32>, vector<4x32xf32>, vector<1x32xf32> -> vector<1x32xf32>
    %10 = arith.negf %9 : vector<1x32xf32>
    %11 = math.exp %10 : vector<1x32xf32>
    %cst_10 = arith.constant 1.000000e+00 : f32
    %12 = vector.broadcast %cst_10 : f32 to vector<1x32xf32>
    %13 = arith.addf %12, %11 : vector<1x32xf32>
    %14 = arith.divf %12, %13 : vector<1x32xf32>
    %cst_11 = arith.constant 1.000000e+00 : f32
    %15 = vector.broadcast %cst_11 : f32 to vector<1x32xf32>
    %16 = arith.addf %15, %14 : vector<1x32xf32>
    %17 = vector.shape_cast %16 : vector<1x32xf32> to vector<1x32x1xf32>
    %18 = vector.broadcast %17 : vector<1x32x1xf32> to vector<1x32x256xf32>
    %19 = arith.mulf %0, %18 : vector<1x32x256xf32>
    %c0_12 = arith.constant 0 : index
    %c0_13 = arith.constant 0 : index
    %c0_14 = arith.constant 0 : index
    %20 = vector.load %arg4[%c0_12, %c0_13, %c0_14] : memref<1x32x256xf32, #tpu.memory_space<vmem>>, vector<1x32x256xf32>
    tpu.vector_store %arg4[%c0_12, %c0_13, %c0_14], %19 {strides = array<i32>} : memref<1x32x256xf32, #tpu.memory_space<vmem>>, vector<1x32x256xf32>,
    return
  }
  func.func @transform_0(%arg0: i32) -> (i32, i32, i32) {
    %c0_i32 = arith.constant 0 : i32
    %c0_i32_0 = arith.constant 0 : i32
    %c0_i32_1 = arith.constant 0 : i32
    return %arg0, %c0_i32, %c0_i32_0 : i32, i32, i32
  }
  func.func @transform_1(%arg0: i32) -> (i32, i32) {
    %c0_i32 = arith.constant 0 : i32
    %c0_i32_0 = arith.constant 0 : i32
    %c0_i32_1 = arith.constant 0 : i32
    return %c0_i32, %c0_i32_0 : i32, i32
  }
  func.func @transform_2(%arg0: i32) -> (i32, i32) {
    %c0_i32 = arith.constant 0 : i32
    %c0_i32_0 = arith.constant 0 : i32
    %c0_i32_1 = arith.constant 0 : i32
    return %c0_i32, %c0_i32_0 : i32, i32
  }
  func.func @transform_3(%arg0: i32) -> (i32, i32, i32) {
    %c0_i32 = arith.constant 0 : i32
    %c0_i32_0 = arith.constant 0 : i32
    %c0_i32_1 = arith.constant 0 : i32
    return %arg0, %c0_i32, %c0_i32_0 : i32, i32, i32
  }
}

</mosaic_0001>

<bundles_post_ra>
// kernel: tpu_custom_call.1
= control target key start
LH: loop header
LB: loop body
LE: loop exit
PB: predicated region body
PF: predicated region fallthrough
CT: control target
= control target key end

     0   :  { %8 = vsyncpa [#allocation3], 0  ;;  %s976_s0 = inlined_call_operand.hbm [shape: f32[2,32,256], index: 0, kind: input, shape index: {}]   ;;  %s977_s1 = inlined_call_operand.vmem [shape: f32[32,4], index: 1, kind: input, shape index: {}]   ;;  %s978_s2 = inlined_call_operand.vmem [shape: f32[4,32], index: 2, kind: input, shape index: {}]   ;;  %s979_s3 = inlined_call_operand.hbm [shape: f32[2,32,256], index: 3, kind: output, shape index: {}]  }
   0x1   :  { %10 = vsyncpa [#allocation3 + $0x1], 0 }
   0x2   :  { %11 = vsyncpa [#allocation4], 0 }
   0x3   :  { %13 = vsyncpa [#allocation4 + $0x1], 0  ;;  %s763_s12 = smov 0   ;;  %s765_s13 = smov 0  }
   0x4   :  { %s767_s14 = smov 0   ;;  %s769_s15 = smov 0  }
   0x5 LB: > { %s784_s16 = sadd.s32 4294967295, %s732_s15   ;;  %s530_s17 = sadd.s32 4294967294, %s732_s15   ;;  %s732_s15 = sphi %s769_s15, %s992_s15   ;;  %s728_s14 = sphi %s767_s14, %s991_s14   ;;  %s724_s13 = sphi %s765_s13, %s990_s13   ;;  %s720_s12 = sphi %s763_s12, %s989_s12  }
   0x6   : > { %s788_s18 = sadd.s32 1, %s732_s15   ;;  %s26_s19 = sadd.s32 1, %s728_s14 }
   0x7   : > { %s23_s20 = ssub.s32 %s732_s15, %s788_s18  ;;  %p33_p0 = scmp.ne.s32.totalorder %s728_s14, %s724_s13 }
   0x8   : > { %p24_p1 = scmp.eq.s32.totalorder %s23_s20, 0  ;;  %p34_p2 = scmp.eq.s32.totalorder %s732_s15, 0 }
   0x9   : > { %p39_p3 = scmp.ne.s32.totalorder %s724_s13, %s720_s12  ;;  %p40_p4 = scmp.eq.s32.totalorder %s784_s16, 0 }
   0xa   : > { %s800_s21 = scalar_select %p24_p1, %s728_s14, %s26_s19  }
   0xb   : > { %p802_p5 = por %p34_p2, %p33_p0  ;;  %p806_p6 = por %p40_p4, %p39_p3 }
   0xc   : > { %p105_p7 = scmp.eq.s32.totalorder %s784_s16, 1  ;;  %p111_p8 = scmp.eq.s32.totalorder %s530_s17, 1 }
   0xd   : > { %p591_p10 = scmp.lt.s32.totalorder %s732_s15, 2  ;;  %s137_s26 = sand.u32 1, %s728_s14  }
   0xe   : > { %p813_p11 = por %p105_p7, %p33_p0  ;;  %p817_p12 = por %p111_p8, %p39_p3 }
   0xf   : > { %s548_s27 = sshll.u32 %s732_s15, 10  ;;  %s533_s28 = sshll.u32 %s137_s26, 6 }
  0x10   : > { %s983_s24 = scalar_select %p813_p11, 1, 0 }
  0x11   : > { %s984_s25 = scalar_select %p817_p12, 1, 0 }
  0x12   : > { %s826_s4 = scalar_lea.hbm %s976_s0, %s548_s27  ;;  %s141_s5 = scalar_lea.vmem [#allocation2], %s533_s28 }
  0x13   : > { %s148_s6 = sshll.u32 %s141_s5, 4  ;;  %p830_p13 = pnand %p591_p10, %p802_p5  ;;  %s834_s6 = int_to_ptr.vmem [resolvable:$true] %s148_s6 }
  0x14   : > { %s836_s8 = scalar_lea.sflag [#allocation3], %s137_s26  ;;  %s636_s9 = scalar_lea.hbm %s826_s4, 1024 }
  0x15   : > { %p637_p0 = scmp.ne.s32.totalorder %s826_s4, %s636_s9  ;;  %p638_p1 = pneg %p830_p13 }
  0x16   : > { %s641_s17 = scalar_lea.hbm %s976_s0, 2048  ;;  %p642_p4 = scmp.lt.u32.totalorder %s826_s4, %s976_s0 }
  0x17   : > { %p639_p2 = pnand %p638_p1, %p637_p0  ;;  %p643_p5 = scmp.lt.u32.totalorder %s641_s17, %s636_s9 }
  0x18   : > { %p645_p8 = scmp.lt.u32.totalorder %s636_s9, %s826_s4 }
  0x19   : > { %p640_p3 = pneg %p639_p2  ;;  %p644_p7 = por %p643_p5, %p642_p4 }
  0x1b   : > { %p646_p10 = por %p645_p8, %p644_p7 }
  0x1d   : > { %p647_p9 = pnand %p646_p10, %p640_p3 }
  0x1f   : > { %650 = shalt.err (!%p647_p9)
}
  0x20   : > { %s651_s22 = scalar_lea.vmem %s834_s6, 1024  ;;  %s734_s26 = smov [#allocation2]  }
  0x21   : > { %p652_p0 = scmp.ne.s32.totalorder %s834_s6, %s651_s22  ;;  %s656_s27 = sshll.u32 %s734_s26, 4  ;;  %s657_s27 = int_to_ptr.vmem [resolvable:$false] %s656_s27 }
  0x22   : > { %s658_s28 = scalar_lea.vmem %s657_s27, 2048  ;;  %p659_p11 = scmp.lt.s32.totalorder %s834_s6, %s657_s27 }
  0x23   : > { %p654_p2 = pnand %p652_p0, %p638_p1  ;;  %p660_p4 = scmp.lt.s32.totalorder %s658_s28, %s651_s22 }
  0x25   : > { %p655_p12 = pneg %p654_p2  ;;  %p661_p5 = por %p660_p4, %p659_p11 }
  0x27   : > { %p662_p7 = pnand %p661_p5, %p655_p12 }
  0x29   : > { %665 = shalt.err (!%p662_p7)
}
  0x2a   : > { %s735_s29 = smov 256   ;;  %s736_s30 = smov 16  }
  0x2b   : > { %586 = dma.hbm_to_vmem [thread:$0]  (!%p830_p13), %s826_s4, 1024, %s834_s6, %s836_s8, %s735_s29, %s735_s29, %s736_s30  }
  0x2c   : > { %p536_p9 = scmp.ge.s32.totalorder %s732_s15, 1  ;;  %p156_p1 = scmp.lt.s32.totalorder %s732_s15, 3 }
  0x2e   : > { %p157_p3 = pnand %p536_p9, %p156_p1 }
  0x2f   : > { %s867_s5 = sand.u32 (!%p157_p3), 1, %s724_s13  }
  0x30   : > { %160 = sbr.rel (%p157_p3) target bundleno = 808 (0x328), region = 32  ;;  %s537_s9 = sshll.u32 (!%p157_p3), %s867_s5, 6 }
  0x31   : > { %s163_s10 = scalar_lea.sflag (!%p157_p3), [#allocation3], %s867_s5  ;;  %s166_s11 = scalar_lea.vmem (!%p157_p3), [#allocation2], %s537_s9 }
  0x37   : > { %711 = dma.done.wait (%p806_p6), %s163_s10, 1024  }
  0x38   : > { %713 = vsyncadd (%p806_p6), %s163_s10, 4294966272  ;;  %v877_v0 = vld [vmem:[%s166_s11] sm:$0xff]  ;;  %v879_v1 = vld [vmem:[%s166_s11 + $0x8] sm:$0xff]  ;;  %v737_v15 = vmov 0.0|0.0   ;;  %vm738_vm0 = vmmov 0   ;;  %v739_v19 = vmov 0.0   ;;  %v221_v20 = vlaneseq }
  0x39   : > { %v881_v2 = vld [vmem:[%s166_s11 + $0x20] sm:$0xff]  ;;  %v197_v3 = vadd.f32 %v879_v1, %v877_v0  ;;  %v885_v4 = vld [vmem:[%s166_s11 + $0x28] sm:$0xff]  ;;  %v887_v5 = vld [vmem:[%s166_s11 + $0x10] sm:$0xff]  ;;  %573 = vmatprep.subr.bf16.mxu0 %v737_v15  ;;  %565 = vmatprep.mubr.msk.f32.mxu0 %vm738_vm0, %v739_v19  ;;  %vm232_vm1 = vcmask 130112   ;;  %vm239_vm2 = vcmask 195712   ;;  %vm246_vm3 = vcmask 261312  }
  0x3a   : > { %v889_v6 = vld [vmem:[%s166_s11 + $0x18] sm:$0xff]  ;;  %v203_v7 = vadd.f32 %v885_v4, %v881_v2  ;;  %v893_v8 = vld [vmem:[%s166_s11 + $0x30] sm:$0xff]  ;;  %v213_v12 = vld [vmem:[%s977_s1] sm:$0xff]  ;;  %568 = vmatprep.subr.mxu1 %v739_v19  ;;  %570 = vmatprep.mubr.msk.f32.mxu1 %vm738_vm0, %v739_v19  ;;  %v222_v21 = vand.u32 127, %v221_v20  ;;  %v224_v22 = vshrl.u32 %v221_v20, 7  ;;  %vm248_vm4 = vcmask 261120  }
  0x3b   : > { %v895_v9 = vld [vmem:[%s166_s11 + $0x38] sm:$0xff]  ;;  %198 = vadd.xlane.f32.xlu0 %v197_v3  ;;  %v200_v10 = vadd.f32 %v889_v6, %v887_v5  ;;  %v214_v13 = vld [vmem:[%s977_s1 + $0x8] sm:$0xff]  ;;  %v215_v16 = vld [vmem:[%s977_s1 + $0x10] sm:$0xff]  ;;  %vm327_vm5 = vcmask 1043456   ;;  %vm323_vm6 = vcmask 31744   ;;  %s188_s27 = scalar_lea.vmem [#allocation5], %s537_s9 }
  0x3c   : > { %204 = vadd.xlane.f32.xlu1 %v203_v7  ;;  %v206_v11 = vadd.f32 %v895_v9, %v893_v8  ;;  %v574_v14 = vpack.c.bf16 %v214_v13, %v213_v12  ;;  %v216_v17 = vld [vmem:[%s977_s1 + $0x18] sm:$0xff]  ;;  %v227_v23 = vadd.s32 4294967288, %v222_v21  ;;  %v234_v25 = vadd.s32 4294967280, %v222_v21  ;;  %v322_v45 = vld [vmem:[%s978_s2] sm:$0xf]  ;;  %s457_s28 = sshll.u32 %s188_s27, 4  ;;  %s925_s28 = int_to_ptr.vmem [resolvable:$true] %s457_s28 }
  0x3d   : > { %v577_v18 = vpack.c.bf16 %v216_v17, %v215_v16  ;;  %v241_v26 = vadd.s32 4294967272, %v222_v21  ;;  %v225_v28 = vsub.s32 %v222_v21, %v224_v22  ;;  %569 = vmatpush3.msk.msra.mxu1 %vm327_vm5, %v322_v45  ;;  %v410_v54 = vsub.s32 0, %v224_v22  ;;  %s549_s29 = sshll.u32 %s784_s16, 10  ;;  %s444_s16 = scalar_lea.sflag [#allocation4], %s867_s5 }
  0x3e   : > { %575 = vmatpush3.bf16.msra.mxu0 %v574_v14  ;;  %v230_v30 = vsub.s32 %v227_v23, %v224_v22  ;;  %v237_v31 = vsub.s32 %v234_v25, %v224_v22  ;;  %s930_s10 = scalar_lea.hbm %s979_s3, %s549_s29  ;;  %s666_s11 = scalar_lea.vmem %s925_s28, 1024 }
  0x3f   : > { %201 = vadd.xlane.f32.xlu0 %v200_v10  ;;  %576 = vmatprep.subr.bf16.mxu0 %v737_v15  ;;  %v244_v34 = vsub.s32 %v241_v26, %v224_v22  ;;  %p667_p6 = scmp.ne.s32.totalorder %s925_s28, %s666_s11  ;;  %p986_p11 = scmp.ne.s32.totalorder %s983_s24, 0 }
  0x40   : > { %207 = vadd.xlane.f32.xlu1 %v206_v11  ;;  %s740_s23 = smov [#allocation5]  }
  0x41   : > { %p668_p12 = pnand %p667_p6, %p986_p11  ;;  %s670_s4 = sshll.u32 %s740_s23, 4  ;;  %s671_s4 = int_to_ptr.vmem [resolvable:$false] %s670_s4 }
  0x42   : > { %578 = vmatpush3.bf16.msra.mxu0 %v577_v18  ;;  %s672_s6 = scalar_lea.vmem %s671_s4, 2048  ;;  %p673_p8 = scmp.lt.s32.totalorder %s925_s28, %s671_s4 }
  0x43   : > { %p669_p13 = pneg %p668_p12  ;;  %p674_p10 = scmp.lt.s32.totalorder %s672_s6, %s666_s11 }
  0x45   : > { %p675_p0 = por %p674_p10, %p673_p8 }
  0x47   : > { %p676_p2 = pnand %p675_p0, %p669_p13 }
  0xc8   : > { %v199_v24 = vpop.xlane.xlu0 %198 }
  0xc9   : > { %v205_v27 = vpop.xlane.xlu1 %204  ;;  %v209_v29 = vmul.f32 0.00390625, %v199_v24 }
  0xca   : > { %v211_v32 = vmul.f32 0.00390625, %v205_v27 }
  0xcb   : > { %v226_v38 = vrot.slane %v209_v29, %v225_v28 }
  0xcc   : > { %v202_v33 = vpop.xlane.xlu0 %201  ;;  %v238_v40 = vrot.slane %v211_v32, %v237_v31 }
  0xcd   : > { %v210_v35 = vmul.f32 0.00390625, %v202_v33  ;;  %v208_v36 = vpop.xlane.xlu1 %207 }
  0xce   : > { %v212_v37 = vmul.f32 0.00390625, %v208_v36 }
  0xcf   : > { %v231_v39 = vrot.slane %v210_v35, %v230_v30 }
  0xd0   : > { %v245_v41 = vrot.slane %v212_v37, %v244_v34 }
  0xd1   : > { %v233_v42 = vsel %vm232_vm1, %v231_v39, %v226_v38 }
  0xd2   : > { %v240_v43 = vsel %vm239_vm2, %v238_v40, %v233_v42 }
  0xd3   : > { %v247_v44 = vsel %vm246_vm3, %v245_v41, %v240_v43 }
  0xd4   : > { %566 = vmatmul.mubr.msk.f32.vlgmr.msra.gmra.mrb[0].mxu0 %vm248_vm4, %v247_v44 }
 0x1a7   : > { %v317_v46 = vpop.f32.mrb[0].mxu0 }
 0x1a8   : > { %v321_v47 = vmax.f32 %v317_v46, 0.0  ;;  %v567_v48 = vpop.f32.mrb[1].mxu0 }
 0x1aa   : > { %571 = vmatmul.mubr.msk.f32.vlgmr.msra.gmra.mrb[0].mxu1 %vm323_vm6, %v321_v47 }
 0x27d   : > { %v397_v49 = vpop.f32.mrb[0].mxu1 }
 0x27e   : > { %v542_v50 = vmul.f32 -1.442695, %v397_v49  ;;  %v572_v51 = vpop.f32.mrb[1].mxu1 }
 0x280   : > { %632 = vpow2.f32 %v542_v50 }
 0x28a   : > { %v633_v52 = vpop.eup %632 }
 0x28b   : > { %v404_v53 = vadd.f32 1.0, %v633_v52 }
 0x28d   : > { %634 = vrcp.f32 %v404_v53 }
 0x297   : > { %v635_v55 = vpop.eup %634 }
 0x298   : > { %v407_v56 = vadd.f32 1.0, %v635_v55 }
 0x29a   : > { %v411_v57 = vrot.slane %v407_v56, %v410_v54 }
 0x29c   : > { %417 = vbcast.lane.b32.xlu1 %v411_v57, 264  ;;  %413 = vbcast.lane.b32.xlu0 %v411_v57, 256 }
 0x2a0   : > { %421 = vbcast.lane.b32.xlu1 %v411_v57, 272 }
 0x2a4   : > { %425 = vbcast.lane.b32.xlu1 %v411_v57, 280 }
 0x30e   : > { %v418_v58 = vpop.permute.xlu1 %417  ;;  %v414_v59 = vpop.permute.xlu0 %413 }
 0x30f   : > { %v429_v60 = vmul.f32 %v418_v58, %v887_v5  ;;  %v430_v61 = vmul.f32 %v418_v58, %v889_v6  ;;  %v427_v62 = vmul.f32 %v414_v59, %v877_v0  ;;  %v428_v63 = vmul.f32 %v414_v59, %v879_v1 }
 0x311   : > { %437 = vst [vmem:[%s188_s27 + $0x10] sm:$0xff] %v429_v60  ;;  %438 = vst [vmem:[%s188_s27 + $0x18] sm:$0xff] %v430_v61 }
 0x312   : > { %435 = vst [vmem:[%s188_s27] sm:$0xff] %v427_v62  ;;  %436 = vst [vmem:[%s188_s27 + $0x8] sm:$0xff] %v428_v63  ;;  %v422_v3 = vpop.permute.xlu1 %421 }
 0x313   : > { %v431_v7 = vmul.f32 %v422_v3, %v881_v2  ;;  %v432_v5 = vmul.f32 %v422_v3, %v885_v4 }
 0x315   : > { %439 = vst [vmem:[%s188_s27 + $0x20] sm:$0xff] %v431_v7  ;;  %440 = vst [vmem:[%s188_s27 + $0x28] sm:$0xff] %v432_v5 }
 0x316   : > { %v426_v0 = vpop.permute.xlu1 %425 }
 0x317   : > { %v433_v1 = vmul.f32 %v426_v0, %v893_v8  ;;  %v434_v2 = vmul.f32 %v426_v0, %v895_v9 }
 0x319   : > { %441 = vst [vmem:[%s188_s27 + $0x30] sm:$0xff] %v433_v1  ;;  %442 = vst [vmem:[%s188_s27 + $0x38] sm:$0xff] %v434_v2 }
 0x31a   : > { %679 = shalt.err (!%p676_p2)
}
 0x31b   : > { %s680_s7 = scalar_lea.hbm %s930_s10, 1024  ;;  %s684_s19 = scalar_lea.hbm %s979_s3, 2048 }
 0x31c   : > { %p681_p4 = scmp.ne.s32.totalorder %s930_s10, %s680_s7  ;;  %p685_p9 = scmp.lt.u32.totalorder %s930_s10, %s979_s3 }
 0x31d   : > { %p686_p1 = scmp.lt.u32.totalorder %s684_s19, %s680_s7  ;;  %p688_p6 = scmp.lt.u32.totalorder %s680_s7, %s930_s10 }
 0x31e   : > { %p682_p5 = pnand %p681_p4, %p986_p11 }
 0x31f   : > { %p687_p3 = por %p686_p1, %p685_p9 }
 0x320   : > { %p683_p7 = pneg %p682_p5 }
 0x321   : > { %p689_p12 = por %p688_p6, %p687_p3 }
 0x323   : > { %p690_p13 = pnand %p689_p12, %p683_p7 }
 0x325   : > { %693 = shalt.err (!%p690_p13)
}
 0x326   : > { %s741_s26 = smov 256   ;;  %s742_s27 = smov 16  }
 0x327   : > { %581 = dma.vmem_to_hbm [thread:$0]  (%p986_p11), %s925_s28, 1024, %s930_s10, %s444_s16, %s741_s26, %s741_s26, %s742_s27  }
 0x328 PF: > { %s472_s29 = sand.u32 1, %s720_s12   ;;  %p987_p8 = scmp.ne.s32.totalorder %s984_s25, 0 }
 0x329   : > { %p988_p10 = scmp.ge.s32.totalorder %s732_s15, 2  ;;  %s473_s30 = scalar_lea.sflag [#allocation4], %s472_s29 }
 0x32b   : > { %p588_p0 = pnand %p988_p10, %p987_p8 }
 0x32d   : > { %715 = dma.done.wait (!%p588_p0), %s473_s30, 1024  }
 0x32e   : > { %717 = vsyncadd (!%p588_p0), %s473_s30, 4294966272  ;;  %p16_p2 = scmp.ge.s32.totalorder %s788_s18, 4   ;;  %s989_s12 = smov %s724_s13 }
 0x32f   : > { %s990_s13 = smov %s728_s14  ;;  %s991_s14 = smov %s800_s21 }
 0x330   : > { %s992_s15 = smov %s788_s18  ;;  %18 = sbr.rel (!%p16_p2) target bundleno = 5 (0x5), region = 77 }
 0x337   :  { %478 = vsyncpa [#allocation3], 1 }
 0x338   :  { %480 = vsyncpa [#allocation3 + $0x1], 1 }
 0x339   :  { %481 = vsyncpa [#allocation4], 1 }
 0x33a   :  { %483 = vsyncpa [#allocation4 + $0x1], 1 }

</bundles_post_ra>
